<compile_context>
chip_gen: v7x
topology: tpu7x:2x2x1
jax: 0.10.0
libtpu: 0.0.40
codegen_flags: <defaults>
</compile_context>

<pallas_src>
import functools
import math

import jax
import jax.numpy as jnp
from jax import lax
from jax.experimental import pallas as pl
from jax.experimental.pallas import tpu as pltpu


def mha_kernel(
    q_ref, k_ref, v_ref,
    wq_ref, bq_ref, wk_ref, bk_ref, wv_ref, bv_ref,
    wo_ref, bo_ref,
    out_ref,
    k_cache, v_cache,
    *, d_k, group,
):
    s_idx = pl.program_id(1)
    hg = pl.program_id(2)
    cdt = jnp.bfloat16
    inv_sqrt_dk = 1.0 / math.sqrt(d_k)

    # ---- Projected K/V cache: filled once per (batch, head-group), reused
    # for every query tile of the same batch (s_idx > 0).
    @pl.when(s_idx == 0)
    def _fill_kv_cache():
        xk = k_ref[0]                                                   # (S, E) bf16
        xv = v_ref[0]
        kh = jnp.dot(xk, wk_ref[0], preferred_element_type=jnp.float32) + bk_ref[0]
        vh = jnp.dot(xv, wv_ref[0], preferred_element_type=jnp.float32) + bv_ref[0]
        k_cache[hg] = kh.astype(cdt)                                    # (S, G*d_k)
        v_cache[hg] = vh.astype(cdt)

    # ---- Query projection for this tile / head group; fold 1/sqrt(d_k)
    # into q so it costs TQ*G*d_k multiplies instead of TQ*S.
    xq = q_ref[0]                                                       # (TQ, E) bf16
    qh = (jnp.dot(xq, wq_ref[0], preferred_element_type=jnp.float32)
          + bq_ref[0]) * inv_sqrt_dk                                    # (TQ, G*d_k) f32
    qh = qh.astype(cdt)

    kh = k_cache[hg]                                                    # (S, G*d_k) bf16
    vh = v_cache[hg]

    # ---- Per-head attention inside the group (static unroll over G heads).
    # NOTE (faithful to the reference): the mask is never applied to the
    # scores that are used (masked_fill's result is discarded), and dropout
    # is identity.
    parts = []
    for g in range(group):
        lo = g * d_k
        qg = qh[:, lo:lo + d_k]                                         # (TQ, d_k)
        kg = kh[:, lo:lo + d_k]                                         # (S,  d_k)
        vg = vh[:, lo:lo + d_k]                                         # (S,  d_k)

        # scores = qg @ kg.T without materializing the transpose.
        sc = lax.dot_general(
            qg, kg, dimension_numbers=(((1,), (1,)), ((), ())),
            preferred_element_type=jnp.float32)                         # (TQ, S)

        m = jnp.max(sc, axis=-1, keepdims=True)
        p = jnp.exp(sc - m)
        denom = jnp.sum(p, axis=-1, keepdims=True)

        a = jnp.dot(p.astype(cdt), vg, preferred_element_type=jnp.float32)  # (TQ, d_k)
        # Normalize AFTER the PV matmul: S/d_k x less VALU work.
        a = a * pl.reciprocal(denom, approx=True)
        parts.append(a.astype(cdt))

    ah = parts[0] if group == 1 else jnp.concatenate(parts, axis=-1)    # (TQ, G*d_k)

    # This head-group's contribution to the output projection (lane-dense
    # G*d_k contraction).
    partial = jnp.dot(ah, wo_ref[0], preferred_element_type=jnp.float32)    # (TQ, E)

    @pl.when(hg == 0)
    def _first_group():
        out_ref[0] = partial + bo_ref[...]        # single write, no init pass

    @pl.when(hg > 0)
    def _accumulate():
        out_ref[0] += partial


def multi_head_attention(k, q, v, params, *, num_heads, mask=None):
    """Pallas equivalent of MultiHeadAttentionBlock.forward(k, q, v, mask).

    `mask` is accepted but ignored (see faithfulness note at the top).
    `params` holds (in, out)-layout weights (i.e. the transposed PyTorch
    nn.Linear weight) and (E,) biases.
    """
    del mask  # faithfully unused
    B, S, E = q.shape
    assert E % num_heads == 0, "embedding_dim must be divisible by num_heads"
    d_k = E // num_heads

    # Head group size: make per-group matmul operand widths lane-dense
    # (target 256 lanes, automatically a multiple of 128), clipped to a
    # divisor of num_heads.
    group = min(num_heads, max(1, 256 // d_k))
    while num_heads % group != 0:
        group -= 1
    gdk = group * d_k
    hg_count = num_heads // group

    # VMEM budget: physical capacity minus headroom (caps at ~48 MiB on v7x,
    # ~100 MiB on v5e/v6e).
    try:
        phys_vmem = int(pltpu.get_tpu_info().vmem_capacity_bytes)
    except Exception:
        phys_vmem = 64 << 20
    vmem_cap = max(32 << 20, min(phys_vmem - (16 << 20), 100 << 20))

    # Query-sequence tile.
    if S % 512 == 0 and vmem_cap >= (96 << 20):
        tq = 512
    elif S % 256 == 0:
        tq = 256
    elif S % 128 == 0:
        tq = 128
    else:
        tq = S

    wdt = jnp.bfloat16

    def split_w(w):  # (E, E) (in, out) -> (HG, E, G*d_k)
        return jnp.asarray(w).reshape(E, hg_count, gdk).transpose(1, 0, 2).astype(wdt)

    def split_b(b):  # (E,) -> (HG, 1, G*d_k)
        return jnp.asarray(b).reshape(hg_count, 1, gdk).astype(jnp.float32)

    wq_h = split_w(params["wq"]); bq_h = split_b(params["bq"])
    wk_h = split_w(params["wk"]); bk_h = split_b(params["bk"])
    wv_h = split_w(params["wv"]); bv_h = split_b(params["bv"])
    # Output projection: head-group hg owns input rows hg*gdk:(hg+1)*gdk.
    wo_h = jnp.asarray(params["wo"]).reshape(hg_count, gdk, E).astype(wdt)
    bo = jnp.asarray(params["bo"]).reshape(1, E).astype(jnp.float32)

    # Activations travel in bf16 (halves HBM traffic + resident K/V VMEM).
    q_b = q.astype(wdt)
    k_b = k.astype(wdt)
    v_b = v.astype(wdt)

    grid = (B, S // tq, hg_count)

    x_spec = pl.BlockSpec((1, tq, E), lambda b, s, h: (b, s, 0))
    kv_spec = pl.BlockSpec((1, S, E), lambda b, s, h: (b, 0, 0))
    w_spec = pl.BlockSpec((1, E, gdk), lambda b, s, h: (h, 0, 0))
    b_spec = pl.BlockSpec((1, 1, gdk), lambda b, s, h: (h, 0, 0))
    wo_spec = pl.BlockSpec((1, gdk, E), lambda b, s, h: (h, 0, 0))
    bo_spec = pl.BlockSpec((1, E), lambda b, s, h: (0, 0))
    out_spec = pl.BlockSpec((1, tq, E), lambda b, s, h: (b, s, 0))

    # Rough VMEM accounting: double-buffered blocks + persistent caches.
    block_bytes = (
        2 * 2 * (tq * E)                       # q tile (bf16, x2 buffers)
        + 2 * 2 * (2 * S * E)                  # k, v slabs (bf16, x2 buffers)
        + 2 * 2 * (3 * E * gdk + gdk * E)      # per-group weights (bf16, x2)
        + 2 * 4 * (tq * E)                     # output tile (f32, x2)
        + 2 * (2 * S * E)                      # projected K/V caches (bf16)
    )
    vmem_limit = int(min(max(block_bytes + (8 << 20), 32 << 20), vmem_cap))

    flops = int(
        2 * B * S * E * E * 3     # q / k / v projections
        + 2 * B * S * S * E       # scores
        + 2 * B * S * S * E       # attn @ v
        + 2 * B * S * E * E       # output projection
    )
    transcendentals = int(B * num_heads * S * S)  # exp in softmax
    bytes_accessed = int(
        2 * (3 * B * S * E)       # activations in (bf16)
        + 4 * (B * S * E)         # output (f32)
        + 2 * (4 * E * E)         # weights (bf16)
        + 4 * (4 * E)             # biases (f32)
    )

    kernel = functools.partial(mha_kernel, d_k=d_k, group=group)

    return pl.pallas_call(
        kernel,
        out_shape=jax.ShapeDtypeStruct((B, S, E), jnp.float32),
        grid_spec=pltpu.PrefetchScalarGridSpec(
            num_scalar_prefetch=0,
            grid=grid,
            in_specs=[
                x_spec, kv_spec, kv_spec,
                w_spec, b_spec, w_spec, b_spec, w_spec, b_spec,
                wo_spec, bo_spec,
            ],
            out_specs=out_spec,
            scratch_shapes=[
                pltpu.VMEM((hg_count, S, gdk), wdt),   # projected K cache
                pltpu.VMEM((hg_count, S, gdk), wdt),   # projected V cache
            ],
        ),
        compiler_params=pltpu.CompilerParams(
            # The s-tile axis stays "arbitrary" so the per-batch K/V cache
            # fill at s_tile == 0 always precedes its reuse on every core.
            dimension_semantics=("parallel", "arbitrary", "arbitrary"),
            vmem_limit_bytes=vmem_limit,
        ),
        cost_estimate=pl.CostEstimate(
            flops=flops,
            transcendentals=transcendentals,
            bytes_accessed=bytes_accessed,
        ),
    )(q_b, k_b, v_b, wq_h, bq_h, wk_h, bk_h, wv_h, bv_h, wo_h, bo)


def mha_reference(k, q, v, params, num_heads):
    """Plain-JAX (f32) reference matching the PyTorch module."""
    B, S, E = q.shape
    d_k = E // num_heads

    query = q @ params["wq"] + params["bq"]
    key = k @ params["wk"] + params["bk"]
    value = v @ params["wv"] + params["bv"]

    def split(t):
        return t.reshape(B, S, num_heads, d_k).transpose(0, 2, 1, 3)

    qh, kh, vh = split(query), split(key), split(value)
    scores = jnp.einsum("bhqd,bhkd->bhqk", qh, kh) / math.sqrt(d_k)
    # mask intentionally not applied (masked_fill result discarded in ref).
    w = jax.nn.softmax(scores, axis=-1)
    x = jnp.einsum("bhqk,bhkd->bhqd", w, vh)
    x = x.transpose(0, 2, 1, 3).reshape(B, S, E)
    return x @ params["wo"] + params["bo"]


if __name__ == "__main__":
    B, S, E, H = 2, 8, 32, 4

    key = jax.random.PRNGKey(0)
    ks = jax.random.split(key, 12)
    scale = 0.05

    params = {
        # Weights stored as (in, out) == transposed PyTorch nn.Linear weight.
        "wq": scale * jax.random.normal(ks[0], (E, E), jnp.float32),
        "bq": scale * jax.random.normal(ks[1], (E,), jnp.float32),
        "wk": scale * jax.random.normal(ks[2], (E, E), jnp.float32),
        "bk": scale * jax.random.normal(ks[3], (E,), jnp.float32),
        "wv": scale * jax.random.normal(ks[4], (E, E), jnp.float32),
        "bv": scale * jax.random.normal(ks[5], (E,), jnp.float32),
        "wo": scale * jax.random.normal(ks[6], (E, E), jnp.float32),
        "bo": scale * jax.random.normal(ks[7], (E,), jnp.float32),
    }

    q = jax.random.normal(ks[8], (B, S, E), jnp.float32)
    k = jax.random.normal(ks[9], (B, S, E), jnp.float32)
    v = jax.random.normal(ks[10], (B, S, E), jnp.float32)
    src_mask = jnp.ones((B, 1, 1, S), jnp.float32)  # accepted, ignored (faithful)

    out = multi_head_attention(k, q, v, params, num_heads=H, mask=src_mask)
    out = jax.block_until_ready(out)

    ref = mha_reference(k, q, v, params, H)
    assert out.shape == (B, S, E)
    max_err = float(jnp.max(jnp.abs(out - ref)))
    # bf16 MXU operands + approximate-reciprocal softmax => modest tolerance.
    assert jnp.allclose(out, ref, atol=3e-2, rtol=3e-2), (
        f"mismatch vs JAX reference, max abs err = {max_err}")

    print("KERNEL_OK")
</pallas_src>

<mosaic_0001>
module attributes {stable_mosaic.version = 11 : i64} {
  func.func @mha_kernel(%arg0: i32, %arg1: i32, %arg2: i32, %arg3: memref<1x8x32xbf16, #tpu.memory_space<vmem>>, %arg4: memref<1x8x32xbf16, #tpu.memory_space<vmem>>, %arg5: memref<1x8x32xbf16, #tpu.memory_space<vmem>>, %arg6: memref<1x32x32xbf16, #tpu.memory_space<vmem>>, %arg7: memref<1x1x32xf32, #tpu.memory_space<vmem>>, %arg8: memref<1x32x32xbf16, #tpu.memory_space<vmem>>, %arg9: memref<1x1x32xf32, #tpu.memory_space<vmem>>, %arg10: memref<1x32x32xbf16, #tpu.memory_space<vmem>>, %arg11: memref<1x1x32xf32, #tpu.memory_space<vmem>>, %arg12: memref<1x32x32xbf16, #tpu.memory_space<vmem>>, %arg13: memref<1x32xf32, #tpu.memory_space<vmem>>, %arg14: memref<1x8x32xf32, #tpu.memory_space<vmem>>, %arg15: memref<1x8x32xbf16, #tpu.memory_space<vmem>>, %arg16: memref<1x8x32xbf16, #tpu.memory_space<vmem>>) attributes {dimension_semantics = [#tpu.dimension_semantics<parallel>, #tpu.dimension_semantics<arbitrary>, #tpu.dimension_semantics<arbitrary>], iteration_bounds = array<i64: 2, 1, 1>, scalar_prefetch = 0 : i64, scratch_operands = 2 : i64, tpu.core_type = #tpu.core_type<tc>, window_params = [{transform_indices = @transform_0, window_bounds = array<i64: 1, 8, 32>}, {transform_indices = @transform_1, window_bounds = array<i64: 1, 8, 32>}, {transform_indices = @transform_2, window_bounds = array<i64: 1, 8, 32>}, {transform_indices = @transform_3, window_bounds = array<i64: 1, 32, 32>}, {transform_indices = @transform_4, window_bounds = array<i64: 1, 1, 32>}, {transform_indices = @transform_5, window_bounds = array<i64: 1, 32, 32>}, {transform_indices = @transform_6, window_bounds = array<i64: 1, 1, 32>}, {transform_indices = @transform_7, window_bounds = array<i64: 1, 32, 32>}, {transform_indices = @transform_8, window_bounds = array<i64: 1, 1, 32>}, {transform_indices = @transform_9, window_bounds = array<i64: 1, 32, 32>}, {pipeline_mode = #tpu.pipeline_mode<synchronous>, transform_indices = @transform_10, window_bounds = array<i64: 1, 32>}, {transform_indices = @transform_11, window_bounds = array<i64: 1, 8, 32>}]} {
    %c0_i32 = arith.constant 0 : i32
    %0 = arith.cmpi eq, %arg1, %c0_i32 : i32
    %1 = arith.extui %0 : i1 to i32
    %c0_i32_0 = arith.constant 0 : i32
    %2 = arith.cmpi ne, %1, %c0_i32_0 : i32
    scf.if %2 {
      %c0_38 = arith.constant 0 : index
      %c0_39 = arith.constant 0 : index
      %c0_40 = arith.constant 0 : index
      %99 = vector.load %arg4[%c0_38, %c0_39, %c0_40] : memref<1x8x32xbf16, #tpu.memory_space<vmem>>, vector<1x8x32xbf16>
      %100 = vector.shape_cast %99 : vector<1x8x32xbf16> to vector<8x32xbf16>
      %c0_41 = arith.constant 0 : index
      %c0_42 = arith.constant 0 : index
      %c0_43 = arith.constant 0 : index
      %101 = vector.load %arg5[%c0_41, %c0_42, %c0_43] : memref<1x8x32xbf16, #tpu.memory_space<vmem>>, vector<1x8x32xbf16>
      %102 = vector.shape_cast %101 : vector<1x8x32xbf16> to vector<8x32xbf16>
      %c0_44 = arith.constant 0 : index
      %c0_45 = arith.constant 0 : index
      %c0_46 = arith.constant 0 : index
      %103 = vector.load %arg8[%c0_44, %c0_45, %c0_46] : memref<1x32x32xbf16, #tpu.memory_space<vmem>>, vector<1x32x32xbf16>
      %104 = vector.shape_cast %103 : vector<1x32x32xbf16> to vector<32x32xbf16>
      %cst_47 = arith.constant dense<0.000000e+00> : vector<8x32xf32>
      %105 = tpu.matmul %100, %104, %cst_47 {dimension_numbers = #tpu.dot_dimension_numbers<[1], [0], [0], [1], [0, 0, 1, 1], [], []>} : vector<8x32xbf16>, vector<32x32xbf16>, vector<8x32xf32> -> vector<8x32xf32>
      %c0_48 = arith.constant 0 : index
      %c0_49 = arith.constant 0 : index
      %c0_50 = arith.constant 0 : index
      %106 = vector.load %arg9[%c0_48, %c0_49, %c0_50] : memref<1x1x32xf32, #tpu.memory_space<vmem>>, vector<1x1x32xf32>
      %107 = vector.shape_cast %106 : vector<1x1x32xf32> to vector<1x32xf32>
      %108 = vector.broadcast %107 : vector<1x32xf32> to vector<8x32xf32>
      %109 = arith.addf %105, %108 : vector<8x32xf32>
      %c0_51 = arith.constant 0 : index
      %c0_52 = arith.constant 0 : index
      %c0_53 = arith.constant 0 : index
      %110 = vector.load %arg10[%c0_51, %c0_52, %c0_53] : memref<1x32x32xbf16, #tpu.memory_space<vmem>>, vector<1x32x32xbf16>
      %111 = vector.shape_cast %110 : vector<1x32x32xbf16> to vector<32x32xbf16>
      %cst_54 = arith.constant dense<0.000000e+00> : vector<8x32xf32>
      %112 = tpu.matmul %102, %111, %cst_54 {dimension_numbers = #tpu.dot_dimension_numbers<[1], [0], [0], [1], [0, 0, 1, 1], [], []>} : vector<8x32xbf16>, vector<32x32xbf16>, vector<8x32xf32> -> vector<8x32xf32>
      %c0_55 = arith.constant 0 : index
      %c0_56 = arith.constant 0 : index
      %c0_57 = arith.constant 0 : index
      %113 = vector.load %arg11[%c0_55, %c0_56, %c0_57] : memref<1x1x32xf32, #tpu.memory_space<vmem>>, vector<1x1x32xf32>
      %114 = vector.shape_cast %113 : vector<1x1x32xf32> to vector<1x32xf32>
      %115 = vector.broadcast %114 : vector<1x32xf32> to vector<8x32xf32>
      %116 = arith.addf %112, %115 : vector<8x32xf32>
      %117 = arith.truncf %109 : vector<8x32xf32> to vector<8x32xbf16>
      %118 = arith.index_cast %arg2 : i32 to index
      %c0_58 = arith.constant 0 : index
      %c0_59 = arith.constant 0 : index
      %119 = vector.load %arg15[%118, %c0_58, %c0_59] : memref<1x8x32xbf16, #tpu.memory_space<vmem>>, vector<1x8x32xbf16>
      %120 = vector.shape_cast %119 : vector<1x8x32xbf16> to vector<8x32xbf16>
      %121 = vector.shape_cast %117 : vector<8x32xbf16> to vector<1x8x32xbf16>
      tpu.vector_store %arg15[%118, %c0_58, %c0_59], %121 {strides = array<i32>} : memref<1x8x32xbf16, #tpu.memory_space<vmem>>, vector<1x8x32xbf16>,
      %122 = arith.truncf %116 : vector<8x32xf32> to vector<8x32xbf16>
      %123 = arith.index_cast %arg2 : i32 to index
      %c0_60 = arith.constant 0 : index
      %c0_61 = arith.constant 0 : index
      %124 = vector.load %arg16[%123, %c0_60, %c0_61] : memref<1x8x32xbf16, #tpu.memory_space<vmem>>, vector<1x8x32xbf16>
      %125 = vector.shape_cast %124 : vector<1x8x32xbf16> to vector<8x32xbf16>
      %126 = vector.shape_cast %122 : vector<8x32xbf16> to vector<1x8x32xbf16>
      tpu.vector_store %arg16[%123, %c0_60, %c0_61], %126 {strides = array<i32>} : memref<1x8x32xbf16, #tpu.memory_space<vmem>>, vector<1x8x32xbf16>,
    } else {
    }
    %c0 = arith.constant 0 : index
    %c0_1 = arith.constant 0 : index
    %c0_2 = arith.constant 0 : index
    %3 = vector.load %arg3[%c0, %c0_1, %c0_2] : memref<1x8x32xbf16, #tpu.memory_space<vmem>>, vector<1x8x32xbf16>
    %4 = vector.shape_cast %3 : vector<1x8x32xbf16> to vector<8x32xbf16>
    %c0_3 = arith.constant 0 : index
    %c0_4 = arith.constant 0 : index
    %c0_5 = arith.constant 0 : index
    %5 = vector.load %arg6[%c0_3, %c0_4, %c0_5] : memref<1x32x32xbf16, #tpu.memory_space<vmem>>, vector<1x32x32xbf16>
    %6 = vector.shape_cast %5 : vector<1x32x32xbf16> to vector<32x32xbf16>
    %cst = arith.constant dense<0.000000e+00> : vector<8x32xf32>
    %7 = tpu.matmul %4, %6, %cst {dimension_numbers = #tpu.dot_dimension_numbers<[1], [0], [0], [1], [0, 0, 1, 1], [], []>} : vector<8x32xbf16>, vector<32x32xbf16>, vector<8x32xf32> -> vector<8x32xf32>
    %c0_6 = arith.constant 0 : index
    %c0_7 = arith.constant 0 : index
    %c0_8 = arith.constant 0 : index
    %8 = vector.load %arg7[%c0_6, %c0_7, %c0_8] : memref<1x1x32xf32, #tpu.memory_space<vmem>>, vector<1x1x32xf32>
    %9 = vector.shape_cast %8 : vector<1x1x32xf32> to vector<1x32xf32>
    %10 = vector.broadcast %9 : vector<1x32xf32> to vector<8x32xf32>
    %11 = arith.addf %7, %10 : vector<8x32xf32>
    %cst_9 = arith.constant 0.353553385 : f32
    %12 = vector.broadcast %cst_9 : f32 to vector<8x32xf32>
    %13 = arith.mulf %11, %12 : vector<8x32xf32>
    %14 = arith.truncf %13 : vector<8x32xf32> to vector<8x32xbf16>
    %15 = arith.index_cast %arg2 : i32 to index
    %c0_10 = arith.constant 0 : index
    %c0_11 = arith.constant 0 : index
    %16 = vector.load %arg15[%15, %c0_10, %c0_11] : memref<1x8x32xbf16, #tpu.memory_space<vmem>>, vector<1x8x32xbf16>
    %17 = vector.shape_cast %16 : vector<1x8x32xbf16> to vector<8x32xbf16>
    %18 = arith.index_cast %arg2 : i32 to index
    %c0_12 = arith.constant 0 : index
    %c0_13 = arith.constant 0 : index
    %19 = vector.load %arg16[%18, %c0_12, %c0_13] : memref<1x8x32xbf16, #tpu.memory_space<vmem>>, vector<1x8x32xbf16>
    %20 = vector.shape_cast %19 : vector<1x8x32xbf16> to vector<8x32xbf16>
    %21 = vector.extract_strided_slice %14 {offsets = [0, 0], sizes = [8, 8], strides = [1, 1]} : vector<8x32xbf16> to vector<8x8xbf16>
    %22 = vector.extract_strided_slice %17 {offsets = [0, 0], sizes = [8, 8], strides = [1, 1]} : vector<8x32xbf16> to vector<8x8xbf16>
    %23 = vector.extract_strided_slice %20 {offsets = [0, 0], sizes = [8, 8], strides = [1, 1]} : vector<8x32xbf16> to vector<8x8xbf16>
    %cst_14 = arith.constant dense<0.000000e+00> : vector<8x8xf32>
    %24 = tpu.matmul %21, %22, %cst_14 {dimension_numbers = #tpu.dot_dimension_numbers<[1], [1], [0], [0], [0, 0, 1, 0], [], []>} : vector<8x8xbf16>, vector<8x8xbf16>, vector<8x8xf32> -> vector<8x8xf32>
    %cst_15 = arith.constant dense<0xFF800000> : vector<8xf32>
    %25 = vector.multi_reduction <maximumf>, %24, %cst_15 [1] : vector<8x8xf32> to vector<8xf32>
    %26 = vector.shape_cast %25 : vector<8xf32> to vector<8x1xf32>
    %27 = vector.broadcast %26 : vector<8x1xf32> to vector<8x8xf32>
    %28 = arith.subf %24, %27 : vector<8x8xf32>
    %29 = math.exp %28 : vector<8x8xf32>
    %cst_16 = arith.constant dense<0.000000e+00> : vector<8xf32>
    %30 = vector.multi_reduction <add>, %29, %cst_16 [1] : vector<8x8xf32> to vector<8xf32>
    %31 = vector.shape_cast %30 : vector<8xf32> to vector<8x1xf32>
    %32 = arith.truncf %29 : vector<8x8xf32> to vector<8x8xbf16>
    %cst_17 = arith.constant dense<0.000000e+00> : vector<8x8xf32>
    %33 = tpu.matmul %32, %23, %cst_17 {dimension_numbers = #tpu.dot_dimension_numbers<[1], [0], [0], [1], [0, 0, 1, 1], [], []>} : vector<8x8xbf16>, vector<8x8xbf16>, vector<8x8xf32> -> vector<8x8xf32>
    %34 = tpu.reciprocal %31 {approx = true} : vector<8x1xf32> -> vector<8x1xf32>
    %35 = vector.broadcast %34 : vector<8x1xf32> to vector<8x8xf32>
    %36 = arith.mulf %33, %35 : vector<8x8xf32>
    %37 = arith.truncf %36 : vector<8x8xf32> to vector<8x8xbf16>
    %38 = vector.extract_strided_slice %14 {offsets = [0, 8], sizes = [8, 8], strides = [1, 1]} : vector<8x32xbf16> to vector<8x8xbf16>
    %39 = vector.extract_strided_slice %17 {offsets = [0, 8], sizes = [8, 8], strides = [1, 1]} : vector<8x32xbf16> to vector<8x8xbf16>
    %40 = vector.extract_strided_slice %20 {offsets = [0, 8], sizes = [8, 8], strides = [1, 1]} : vector<8x32xbf16> to vector<8x8xbf16>
    %cst_18 = arith.constant dense<0.000000e+00> : vector<8x8xf32>
    %41 = tpu.matmul %38, %39, %cst_18 {dimension_numbers = #tpu.dot_dimension_numbers<[1], [1], [0], [0], [0, 0, 1, 0], [], []>} : vector<8x8xbf16>, vector<8x8xbf16>, vector<8x8xf32> -> vector<8x8xf32>
    %cst_19 = arith.constant dense<0xFF800000> : vector<8xf32>
    %42 = vector.multi_reduction <maximumf>, %41, %cst_19 [1] : vector<8x8xf32> to vector<8xf32>
    %43 = vector.shape_cast %42 : vector<8xf32> to vector<8x1xf32>
    %44 = vector.broadcast %43 : vector<8x1xf32> to vector<8x8xf32>
    %45 = arith.subf %41, %44 : vector<8x8xf32>
    %46 = math.exp %45 : vector<8x8xf32>
    %cst_20 = arith.constant dense<0.000000e+00> : vector<8xf32>
    %47 = vector.multi_reduction <add>, %46, %cst_20 [1] : vector<8x8xf32> to vector<8xf32>
    %48 = vector.shape_cast %47 : vector<8xf32> to vector<8x1xf32>
    %49 = arith.truncf %46 : vector<8x8xf32> to vector<8x8xbf16>
    %cst_21 = arith.constant dense<0.000000e+00> : vector<8x8xf32>
    %50 = tpu.matmul %49, %40, %cst_21 {dimension_numbers = #tpu.dot_dimension_numbers<[1], [0], [0], [1], [0, 0, 1, 1], [], []>} : vector<8x8xbf16>, vector<8x8xbf16>, vector<8x8xf32> -> vector<8x8xf32>
    %51 = tpu.reciprocal %48 {approx = true} : vector<8x1xf32> -> vector<8x1xf32>
    %52 = vector.broadcast %51 : vector<8x1xf32> to vector<8x8xf32>
    %53 = arith.mulf %50, %52 : vector<8x8xf32>
    %54 = arith.truncf %53 : vector<8x8xf32> to vector<8x8xbf16>
    %55 = vector.extract_strided_slice %14 {offsets = [0, 16], sizes = [8, 8], strides = [1, 1]} : vector<8x32xbf16> to vector<8x8xbf16>
    %56 = vector.extract_strided_slice %17 {offsets = [0, 16], sizes = [8, 8], strides = [1, 1]} : vector<8x32xbf16> to vector<8x8xbf16>
    %57 = vector.extract_strided_slice %20 {offsets = [0, 16], sizes = [8, 8], strides = [1, 1]} : vector<8x32xbf16> to vector<8x8xbf16>
    %cst_22 = arith.constant dense<0.000000e+00> : vector<8x8xf32>
    %58 = tpu.matmul %55, %56, %cst_22 {dimension_numbers = #tpu.dot_dimension_numbers<[1], [1], [0], [0], [0, 0, 1, 0], [], []>} : vector<8x8xbf16>, vector<8x8xbf16>, vector<8x8xf32> -> vector<8x8xf32>
    %cst_23 = arith.constant dense<0xFF800000> : vector<8xf32>
    %59 = vector.multi_reduction <maximumf>, %58, %cst_23 [1] : vector<8x8xf32> to vector<8xf32>
    %60 = vector.shape_cast %59 : vector<8xf32> to vector<8x1xf32>
    %61 = vector.broadcast %60 : vector<8x1xf32> to vector<8x8xf32>
    %62 = arith.subf %58, %61 : vector<8x8xf32>
    %63 = math.exp %62 : vector<8x8xf32>
    %cst_24 = arith.constant dense<0.000000e+00> : vector<8xf32>
    %64 = vector.multi_reduction <add>, %63, %cst_24 [1] : vector<8x8xf32> to vector<8xf32>
    %65 = vector.shape_cast %64 : vector<8xf32> to vector<8x1xf32>
    %66 = arith.truncf %63 : vector<8x8xf32> to vector<8x8xbf16>
    %cst_25 = arith.constant dense<0.000000e+00> : vector<8x8xf32>
    %67 = tpu.matmul %66, %57, %cst_25 {dimension_numbers = #tpu.dot_dimension_numbers<[1], [0], [0], [1], [0, 0, 1, 1], [], []>} : vector<8x8xbf16>, vector<8x8xbf16>, vector<8x8xf32> -> vector<8x8xf32>
    %68 = tpu.reciprocal %65 {approx = true} : vector<8x1xf32> -> vector<8x1xf32>
    %69 = vector.broadcast %68 : vector<8x1xf32> to vector<8x8xf32>
    %70 = arith.mulf %67, %69 : vector<8x8xf32>
    %71 = arith.truncf %70 : vector<8x8xf32> to vector<8x8xbf16>
    %72 = vector.extract_strided_slice %14 {offsets = [0, 24], sizes = [8, 8], strides = [1, 1]} : vector<8x32xbf16> to vector<8x8xbf16>
    %73 = vector.extract_strided_slice %17 {offsets = [0, 24], sizes = [8, 8], strides = [1, 1]} : vector<8x32xbf16> to vector<8x8xbf16>
    %74 = vector.extract_strided_slice %20 {offsets = [0, 24], sizes = [8, 8], strides = [1, 1]} : vector<8x32xbf16> to vector<8x8xbf16>
    %cst_26 = arith.constant dense<0.000000e+00> : vector<8x8xf32>
    %75 = tpu.matmul %72, %73, %cst_26 {dimension_numbers = #tpu.dot_dimension_numbers<[1], [1], [0], [0], [0, 0, 1, 0], [], []>} : vector<8x8xbf16>, vector<8x8xbf16>, vector<8x8xf32> -> vector<8x8xf32>
    %cst_27 = arith.constant dense<0xFF800000> : vector<8xf32>
    %76 = vector.multi_reduction <maximumf>, %75, %cst_27 [1] : vector<8x8xf32> to vector<8xf32>
    %77 = vector.shape_cast %76 : vector<8xf32> to vector<8x1xf32>
    %78 = vector.broadcast %77 : vector<8x1xf32> to vector<8x8xf32>
    %79 = arith.subf %75, %78 : vector<8x8xf32>
    %80 = math.exp %79 : vector<8x8xf32>
    %cst_28 = arith.constant dense<0.000000e+00> : vector<8xf32>
    %81 = vector.multi_reduction <add>, %80, %cst_28 [1] : vector<8x8xf32> to vector<8xf32>
    %82 = vector.shape_cast %81 : vector<8xf32> to vector<8x1xf32>
    %83 = arith.truncf %80 : vector<8x8xf32> to vector<8x8xbf16>
    %cst_29 = arith.constant dense<0.000000e+00> : vector<8x8xf32>
    %84 = tpu.matmul %83, %74, %cst_29 {dimension_numbers = #tpu.dot_dimension_numbers<[1], [0], [0], [1], [0, 0, 1, 1], [], []>} : vector<8x8xbf16>, vector<8x8xbf16>, vector<8x8xf32> -> vector<8x8xf32>
    %85 = tpu.reciprocal %82 {approx = true} : vector<8x1xf32> -> vector<8x1xf32>
    %86 = vector.broadcast %85 : vector<8x1xf32> to vector<8x8xf32>
    %87 = arith.mulf %84, %86 : vector<8x8xf32>
    %88 = arith.truncf %87 : vector<8x8xf32> to vector<8x8xbf16>
    %89 = tpu.concatenate %37, %54, %71, %88 in 1 : vector<8x8xbf16>, vector<8x8xbf16>, vector<8x8xbf16>, vector<8x8xbf16> -> vector<8x32xbf16>
    %c0_30 = arith.constant 0 : index
    %c0_31 = arith.constant 0 : index
    %c0_32 = arith.constant 0 : index
    %90 = vector.load %arg12[%c0_30, %c0_31, %c0_32] : memref<1x32x32xbf16, #tpu.memory_space<vmem>>, vector<1x32x32xbf16>
    %91 = vector.shape_cast %90 : vector<1x32x32xbf16> to vector<32x32xbf16>
    %cst_33 = arith.constant dense<0.000000e+00> : vector<8x32xf32>
    %92 = tpu.matmul %89, %91, %cst_33 {dimension_numbers = #tpu.dot_dimension_numbers<[1], [0], [0], [1], [0, 0, 1, 1], [], []>} : vector<8x32xbf16>, vector<32x32xbf16>, vector<8x32xf32> -> vector<8x32xf32>
    %c0_i32_34 = arith.constant 0 : i32
    %93 = arith.cmpi eq, %arg2, %c0_i32_34 : i32
    %94 = arith.extui %93 : i1 to i32
    %c0_i32_35 = arith.constant 0 : i32
    %95 = arith.cmpi ne, %94, %c0_i32_35 : i32
    scf.if %95 {
      %c0_38 = arith.constant 0 : index
      %c0_39 = arith.constant 0 : index
      %99 = vector.load %arg13[%c0_38, %c0_39] : memref<1x32xf32, #tpu.memory_space<vmem>>, vector<1x32xf32>
      %100 = vector.broadcast %99 : vector<1x32xf32> to vector<8x32xf32>
      %101 = arith.addf %92, %100 : vector<8x32xf32>
      %c0_40 = arith.constant 0 : index
      %c0_41 = arith.constant 0 : index
      %c0_42 = arith.constant 0 : index
      %102 = vector.load %arg14[%c0_40, %c0_41, %c0_42] : memref<1x8x32xf32, #tpu.memory_space<vmem>>, vector<1x8x32xf32>
      %103 = vector.shape_cast %102 : vector<1x8x32xf32> to vector<8x32xf32>
      %104 = vector.shape_cast %101 : vector<8x32xf32> to vector<1x8x32xf32>
      tpu.vector_store %arg14[%c0_40, %c0_41, %c0_42], %104 {strides = array<i32>} : memref<1x8x32xf32, #tpu.memory_space<vmem>>, vector<1x8x32xf32>,
    } else {
    }
    %c0_i32_36 = arith.constant 0 : i32
    %96 = arith.cmpi sgt, %arg2, %c0_i32_36 : i32
    %97 = arith.extui %96 : i1 to i32
    %c0_i32_37 = arith.constant 0 : i32
    %98 = arith.cmpi ne, %97, %c0_i32_37 : i32
    scf.if %98 {
      %c0_38 = arith.constant 0 : index
      %c0_39 = arith.constant 0 : index
      %c0_40 = arith.constant 0 : index
      %99 = vector.load %arg14[%c0_38, %c0_39, %c0_40] : memref<1x8x32xf32, #tpu.memory_space<vmem>>, vector<1x8x32xf32>
      %100 = vector.shape_cast %99 : vector<1x8x32xf32> to vector<8x32xf32>
      %101 = arith.addf %100, %92 : vector<8x32xf32>
      %c0_41 = arith.constant 0 : index
      %c0_42 = arith.constant 0 : index
      %c0_43 = arith.constant 0 : index
      %102 = vector.load %arg14[%c0_41, %c0_42, %c0_43] : memref<1x8x32xf32, #tpu.memory_space<vmem>>, vector<1x8x32xf32>
      %103 = vector.shape_cast %102 : vector<1x8x32xf32> to vector<8x32xf32>
      %104 = vector.shape_cast %101 : vector<8x32xf32> to vector<1x8x32xf32>
      tpu.vector_store %arg14[%c0_41, %c0_42, %c0_43], %104 {strides = array<i32>} : memref<1x8x32xf32, #tpu.memory_space<vmem>>, vector<1x8x32xf32>,
    } else {
    }
    return
  }
  func.func @transform_0(%arg0: i32, %arg1: i32, %arg2: i32) -> (i32, i32, i32) {
    %c0_i32 = arith.constant 0 : i32
    %c0_i32_0 = arith.constant 0 : i32
    return %arg0, %arg1, %c0_i32 : i32, i32, i32
  }
  func.func @transform_1(%arg0: i32, %arg1: i32, %arg2: i32) -> (i32, i32, i32) {
    %c0_i32 = arith.constant 0 : i32
    %c0_i32_0 = arith.constant 0 : i32
    %c0_i32_1 = arith.constant 0 : i32
    return %arg0, %c0_i32, %c0_i32_0 : i32, i32, i32
  }
  func.func @transform_2(%arg0: i32, %arg1: i32, %arg2: i32) -> (i32, i32, i32) {
    %c0_i32 = arith.constant 0 : i32
    %c0_i32_0 = arith.constant 0 : i32
    %c0_i32_1 = arith.constant 0 : i32
    return %arg0, %c0_i32, %c0_i32_0 : i32, i32, i32
  }
  func.func @transform_3(%arg0: i32, %arg1: i32, %arg2: i32) -> (i32, i32, i32) {
    %c0_i32 = arith.constant 0 : i32
    %c0_i32_0 = arith.constant 0 : i32
    %c0_i32_1 = arith.constant 0 : i32
    return %arg2, %c0_i32, %c0_i32_0 : i32, i32, i32
  }
  func.func @transform_4(%arg0: i32, %arg1: i32, %arg2: i32) -> (i32, i32, i32) {
    %c0_i32 = arith.constant 0 : i32
    %c0_i32_0 = arith.constant 0 : i32
    %c0_i32_1 = arith.constant 0 : i32
    return %arg2, %c0_i32, %c0_i32_0 : i32, i32, i32
  }
  func.func @transform_5(%arg0: i32, %arg1: i32, %arg2: i32) -> (i32, i32, i32) {
    %c0_i32 = arith.constant 0 : i32
    %c0_i32_0 = arith.constant 0 : i32
    %c0_i32_1 = arith.constant 0 : i32
    return %arg2, %c0_i32, %c0_i32_0 : i32, i32, i32
  }
  func.func @transform_6(%arg0: i32, %arg1: i32, %arg2: i32) -> (i32, i32, i32) {
    %c0_i32 = arith.constant 0 : i32
    %c0_i32_0 = arith.constant 0 : i32
    %c0_i32_1 = arith.constant 0 : i32
    return %arg2, %c0_i32, %c0_i32_0 : i32, i32, i32
  }
  func.func @transform_7(%arg0: i32, %arg1: i32, %arg2: i32) -> (i32, i32, i32) {
    %c0_i32 = arith.constant 0 : i32
    %c0_i32_0 = arith.constant 0 : i32
    %c0_i32_1 = arith.constant 0 : i32
    return %arg2, %c0_i32, %c0_i32_0 : i32, i32, i32
  }
  func.func @transform_8(%arg0: i32, %arg1: i32, %arg2: i32) -> (i32, i32, i32) {
    %c0_i32 = arith.constant 0 : i32
    %c0_i32_0 = arith.constant 0 : i32
    %c0_i32_1 = arith.constant 0 : i32
    return %arg2, %c0_i32, %c0_i32_0 : i32, i32, i32
  }
  func.func @transform_9(%arg0: i32, %arg1: i32, %arg2: i32) -> (i32, i32, i32) {
    %c0_i32 = arith.constant 0 : i32
    %c0_i32_0 = arith.constant 0 : i32
    %c0_i32_1 = arith.constant 0 : i32
    return %arg2, %c0_i32, %c0_i32_0 : i32, i32, i32
  }
  func.func @transform_10(%arg0: i32, %arg1: i32, %arg2: i32) -> (i32, i32) {
    %c0_i32 = arith.constant 0 : i32
    %c0_i32_0 = arith.constant 0 : i32
    %c0_i32_1 = arith.constant 0 : i32
    return %c0_i32, %c0_i32_0 : i32, i32
  }
  func.func @transform_11(%arg0: i32, %arg1: i32, %arg2: i32) -> (i32, i32, i32) {
    %c0_i32 = arith.constant 0 : i32
    %c0_i32_0 = arith.constant 0 : i32
    return %arg0, %arg1, %c0_i32 : i32, i32, i32
  }
}

</mosaic_0001>

<bundles_post_ra>
// kernel: tpu_custom_call.1
= control target key start
LH: loop header
LB: loop body
LE: loop exit
PB: predicated region body
PF: predicated region fallthrough
CT: control target
= control target key end

     0   :  { %s2728_s0 = inlined_call_operand.hbm [shape: bf16[2,8,32], index: 0, kind: input, shape index: {}]   ;;  %s2729_s1 = inlined_call_operand.hbm [shape: bf16[2,8,32], index: 1, kind: input, shape index: {}]   ;;  %s2730_s2 = inlined_call_operand.hbm [shape: bf16[2,8,32], index: 2, kind: input, shape index: {}]   ;;  %s2731_s3 = inlined_call_operand.hbm [shape: bf16[1,32,32], index: 3, kind: input, shape index: {}]   ;;  %s2732_s4 = inlined_call_operand.vmem [shape: f32[1,1,32], index: 4, kind: input, shape index: {}]   ;;  %s2733_s5 = inlined_call_operand.vmem [shape: bf16[1,32,32], index: 5, kind: input, shape index: {}]   ;;  %s2734_s6 = inlined_call_operand.vmem [shape: f32[1,1,32], index: 6, kind: input, shape index: {}]   ;;  %s2735_s7 = inlined_call_operand.hbm [shape: bf16[1,32,32], index: 7, kind: input, shape index: {}]   ;;  %s2736_s8 = inlined_call_operand.hbm [shape: f32[1,1,32], index: 8, kind: input, shape index: {}]   ;;  %s2737_s9 = inlined_call_operand.vmem [shape: bf16[1,32,32], index: 9, kind: input, shape index: {}]   ;;  %s2738_s10 = inlined_call_operand.vmem [shape: f32[1,32], index: 10, kind: input, shape index: {}]   ;;  %s2739_s11 = inlined_call_operand.hbm [shape: f32[2,8,32], index: 11, kind: output, shape index: {}]  }
   0x1   :  { %2765 = sst [smem:[#allocation29_spill]] %s2729_s1 }
   0x2   :  { %2766 = sst [smem:[#allocation30_spill]] %s2731_s3 }
   0x3   :  { %2767 = sst [smem:[#allocation31_spill]] %s2732_s4 }
   0x4   :  { %2768 = sst [smem:[#allocation32_spill]] %s2734_s6 }
   0x5   :  { %2769 = sst [smem:[#allocation33_spill]] %s2737_s9 }
   0x6   :  { %2770 = sst [smem:[#allocation34_spill]] %s2738_s10 }
   0x7   :  { %2771 = sst [smem:[#allocation35_spill]] %s2739_s11 }
   0x8   :  { %16 = vsyncpa [#allocation5], 0 }
   0x9   :  { %18 = vsyncpa [#allocation5 + $0x1], 0 }
   0xa   :  { %19 = vsyncpa [#allocation8], 0 }
   0xb   :  { %21 = vsyncpa [#allocation8 + $0x1], 0 }
   0xc   :  { %22 = vsyncpa [#allocation11], 0 }
   0xd   :  { %23 = vsyncpa [#allocation14], 0 }
   0xe   :  { %24 = vsyncpa [#allocation6], 0 }
   0xf   :  { %26 = vsyncpa [#allocation6 + $0x1], 0  ;;  %s2285_s17 = smov 0   ;;  %s2287_s18 = smov 0  }
  0x10   :  { %s2289_s19 = smov 0   ;;  %s2291_s20 = smov 0  }
  0x11   :  { %s2293_s21 = smov 0   ;;  %s2295_s22 = smov 0  }
  0x12 LB: > { %2772 = sst [smem:[#allocation21_spill]] %s2186_s17  ;;  %s2316_s23 = sadd.s32 4294967295, %s2206_s22   ;;  %s2206_s22 = sphi %s2295_s22, %s32_s22   ;;  %s2202_s21 = sphi %s2293_s21, %s2820_s21   ;;  %s2198_s20 = sphi %s2291_s20, %s2819_s20   ;;  %s2194_s19 = sphi %s2289_s19, %s2823_s19   ;;  %s2190_s18 = sphi %s2287_s18, %s2822_s18   ;;  %s2186_s17 = sphi %s2285_s17, %s2821_s17  }
  0x13   : > { %2773 = sst [smem:[#allocation22_spill]] %s2198_s20  ;;  %s1637_s24 = sadd.s32 4294967294, %s2206_s22  }
  0x14   : > { %2774 = sst [smem:[#allocation23_spill]] %s2202_s21  ;;  %p73_p0 = scmp.ne.s32.totalorder %s2190_s18, %s2186_s17 }
  0x15   : > { %2775 = sst [smem:[#allocation24_spill]] %s2206_s22  ;;  %p2742_p1 = scmp.eq.s32.totalorder %s2316_s23, 0 }
  0x16   : > { %p360_p3 = scmp.eq.s32.totalorder %s1637_s24, 1  ;;  %p1638_p5 = scmp.ge.s32.totalorder %s2206_s22, 1 }
  0x17   : > { %p2325_p4 = por %p2742_p1, %p73_p0  ;;  %p367_p7 = scmp.lt.s32.totalorder %s2206_s22, 3 }
  0x18   : > { %p2330_p6 = por %p360_p3, %p73_p0  ;;  %s2208_s28 = smov [#allocation10]  }
  0x19   : > { %s2776_s25 = scalar_select %p2325_p4, 1, 0 }
  0x1a   : > { %s2777_s26 = scalar_select %p2330_p6, 1, 0 }
  0x1b   : > { %p2335_p8 = pnand %p1638_p5, %p367_p7  ;;  %s382_s29 = sshll.u32 %s2208_s28, 4  ;;  %s383_s29 = int_to_ptr.vmem [resolvable:$true] %s382_s29 }
  0x1c   : > { %2778 = sst [smem:[#allocation25_spill]] %s2777_s26  ;;  %s51_s12 = sadd.s32 1, %s2202_s21 }
  0x1d   : > { %s2779_s27 = scalar_select %p2335_p8, 1, 0 }
  0x1e   : > { %p1819_p9 = pneg %p2335_p8  ;;  %s2781_s3 = sld [smem:[#allocation30_spill]] }
  0x20   : > { %p2344_p11 = pnand %p1819_p9, %p2742_p1 }
  0x22   : > { %s2780_s30 = scalar_select %p2344_p11, 1, 0 }
  0x23   : > { %p2357_p13 = pneg %p2344_p11 }
  0x24   : > { %s1938_s15 = scalar_lea.hbm %s2781_s3, 256 }
  0x25   : > { %p1939_p12 = scmp.ne.s32.totalorder %s2781_s3, %s1938_s15  ;;  %p1945_p5 = scmp.lt.u32.totalorder %s1938_s15, %s2781_s3 }
  0x26   : > { %s2782_s28 = scalar_select %p2357_p13, 1, 0 }
  0x27   : > { %p1941_p0 = pnand %p2357_p13, %p1939_p12 }
  0x29   : > { %p1942_p3 = pneg %p1941_p0 }
  0x2b   : > { %p1947_p7 = pnand %p1945_p5, %p1942_p3 }
  0x2d   : > { %1950 = shalt.err (!%p1947_p7)
}
  0x2e   : > { %s1951_s13 = scalar_lea.vmem %s383_s29, 256  ;;  %p1959_p2 = scmp.lt.s32.totalorder %s383_s29, %s383_s29 }
  0x2f   : > { %p1952_p9 = scmp.ne.s32.totalorder %s383_s29, %s1951_s13  ;;  %p1960_p6 = scmp.lt.s32.totalorder %s1951_s13, %s1951_s13 }
  0x31   : > { %p1954_p10 = pnand %p1952_p9, %p2357_p13  ;;  %p1961_p4 = por %p1960_p6, %p1959_p2 }
  0x33   : > { %p1955_p1 = pneg %p1954_p10 }
  0x35   : > { %p1962_p8 = pnand %p1961_p4, %p1955_p1 }
  0x37   : > { %1965 = shalt.err (!%p1962_p8)
}
  0x38   : > { %s2746_s14 = smov 64   ;;  %s2747_s17 = smov 4  }
  0x39   : > { %1822 = dma.hbm_to_vmem [thread:$0]  (!%p2344_p11), %s2781_s3, 256, %s383_s29, [#allocation11], %s2746_s14, %s2746_s14, %s2747_s17  }
  0x3a   : > { %p53_p1 = scmp.ge.s32.totalorder %s51_s12, 2  ;;  %s60_s16 = sadd.s32 1, %s2194_s19 }
  0x3b   : > { %p67_p2 = scmp.ne.s32.totalorder %s2194_s19, %s2190_s18  ;;  %p68_p4 = scmp.eq.s32.totalorder %s2206_s22, 0 }
  0x3c   : > { %s2825_s12 = smov (%p53_p1, %s51_s12), 0  ;;  %p2784_p8 = scmp.eq.s32.totalorder %s2316_s23, 1 }
  0x3d   : > { %2783 = sst [smem:[#allocation26_spill]] %s2825_s12  ;;  %p69_p6 = por %p68_p4, %p67_p2 }
  0x3e   : > { %p2384_p10 = por %p2784_p8, %p67_p2  ;;  %s55_s13 = ssub.s32 %s2202_s21, %s2825_s12 }
  0x3f   : > { %p1846_p12 = scmp.lt.s32.totalorder %s2206_s22, 2  ;;  %p58_p0 = scmp.eq.s32.totalorder %s55_s13, 0 }
  0x40   : > { %s2785_s24 = scalar_select %p2384_p10, 1, 0 }
  0x41   : > { %s2749_s11 = sand.u32 1, %s2194_s19   ;;  %s2397_s26 = sshll.u32 %s2202_s21, 6 }
  0x42   : > { %2786 = sst [smem:[#allocation27_spill]] %s2785_s24  ;;  %s2394_s29 = sshll.u32 %s2749_s11, 2 }
  0x43   : > { %s2400_s15 = scalar_select %p58_p0, %s2194_s19, %s60_s16  }
  0x44   : > { %p2402_p3 = pnand %p1846_p12, %p69_p6  ;;  %s475_s17 = sand.u32 1, %s2206_s22  }
  0x45   : > { %2787 = sst [smem:[#allocation28_spill]] %s2400_s15  ;;  %s2789_s1 = sld [smem:[#allocation29_spill]] }
  0x46   : > { %s2788_s14 = scalar_select %p2402_p3, 1, 0 }
  0x47   : > { %s479_s11 = scalar_lea.vmem [#allocation7], %s2394_s29  ;;  %s2211_s16 = smov [#allocation12]  }
  0x48   : > { %s486_s21 = sshll.u32 %s479_s11, 4  ;;  %s2416_s15 = sshll.u32 %s2211_s16, 4  ;;  %s2414_s21 = int_to_ptr.vmem [resolvable:$true] %s486_s21  ;;  %s419_s15 = int_to_ptr.vmem [resolvable:$true] %s2416_s15 }
  0x49   : > { %s2418_s24 = scalar_lea.sflag [#allocation8], %s475_s17  ;;  %p2424_p7 = pneg %p2402_p3 }
  0x4b   : > { %s2411_s13 = scalar_lea.hbm %s2789_s1, %s2397_s26  ;;  %s1971_s22 = scalar_lea.hbm %s2789_s1, 128 }
  0x4c   : > { %s1966_s10 = scalar_lea.hbm %s2411_s13, 64  ;;  %p1972_p2 = scmp.lt.u32.totalorder %s2411_s13, %s2789_s1 }
  0x4d   : > { %p1967_p5 = scmp.ne.s32.totalorder %s2411_s13, %s1966_s10  ;;  %p1973_p4 = scmp.lt.u32.totalorder %s1971_s22, %s1966_s10 }
  0x4e   : > { %s2790_s3 = scalar_select %p2424_p7, 1, 0 }
  0x4f   : > { %p1969_p9 = pnand %p2424_p7, %p1967_p5  ;;  %p1974_p6 = por %p1973_p4, %p1972_p2 }
  0x50   : > { %p1975_p8 = scmp.lt.u32.totalorder %s1966_s10, %s2411_s13 }
  0x51   : > { %p1970_p1 = pneg %p1969_p9 }
  0x52   : > { %p1976_p12 = por %p1975_p8, %p1974_p6 }
  0x54   : > { %p1977_p0 = pnand %p1976_p12, %p1970_p1 }
  0x56   : > { %1980 = shalt.err (!%p1977_p0)
}
  0x57   : > { %s1981_s17 = scalar_lea.vmem %s2414_s21, 64  ;;  %s2212_s12 = smov [#allocation7]  }
  0x58   : > { %p1982_p5 = scmp.ne.s32.totalorder %s2414_s21, %s1981_s17  ;;  %s1986_s11 = sshll.u32 %s2212_s12, 4  ;;  %s1987_s11 = int_to_ptr.vmem [resolvable:$false] %s1986_s11 }
  0x59   : > { %s1988_s20 = scalar_lea.vmem %s1987_s11, 128  ;;  %p1989_p11 = scmp.lt.s32.totalorder %s2414_s21, %s1987_s11 }
  0x5a   : > { %p1984_p9 = pnand %p1982_p5, %p2424_p7  ;;  %p1990_p13 = scmp.lt.s32.totalorder %s1988_s20, %s1981_s17 }
  0x5c   : > { %p1985_p10 = pneg %p1984_p9  ;;  %p1991_p2 = por %p1990_p13, %p1989_p11 }
  0x5e   : > { %p1992_p4 = pnand %p1991_p2, %p1985_p10 }
  0x60   : > { %1995 = shalt.err (!%p1992_p4)
}
  0x61   : > { %1835 = dma.hbm_to_vmem [thread:$0]  (!%p2402_p3), %s2411_s13, 64, %s2414_s21, %s2418_s24  }
  0x62   : > { %s1996_s16 = scalar_lea.hbm %s2735_s7, 256  ;;  %p2791_p11 = scmp.ne.s32.totalorder %s2782_s28, 0 }
  0x63   : > { %p1997_p1 = scmp.ne.s32.totalorder %s2735_s7, %s1996_s16  ;;  %p2003_p6 = scmp.lt.u32.totalorder %s1996_s16, %s2735_s7 }
  0x65   : > { %p1999_p13 = pnand %p1997_p1, %p2791_p11 }
  0x67   : > { %p2000_p10 = pneg %p1999_p13 }
  0x69   : > { %p2005_p8 = pnand %p2003_p6, %p2000_p10 }
  0x6b   : > { %2008 = shalt.err (!%p2005_p8)
}
  0x6c   : > { %s2009_s20 = scalar_lea.vmem %s419_s15, 256  ;;  %p2017_p9 = scmp.lt.s32.totalorder %s419_s15, %s419_s15 }
  0x6d   : > { %p2010_p12 = scmp.ne.s32.totalorder %s419_s15, %s2009_s20  ;;  %p2018_p2 = scmp.lt.s32.totalorder %s2009_s20, %s2009_s20 }
  0x6f   : > { %p2012_p0 = pnand %p2010_p12, %p2791_p11  ;;  %p2019_p4 = por %p2018_p2, %p2017_p9 }
  0x71   : > { %p2013_p5 = pneg %p2012_p0 }
  0x73   : > { %p2020_p3 = pnand %p2019_p4, %p2013_p5 }
  0x75   : > { %2023 = shalt.err (!%p2020_p3)
}
  0x76   : > { %p2792_p1 = scmp.ne.s32.totalorder %s2780_s30, 0  ;;  %s2793_s1 = smov 4  }
  0x77   : > { %s2794_s21 = smov 64   ;;  %s2213_s22 = smov [#allocation13]  }
  0x78   : > { %1825 = dma.hbm_to_vmem [thread:$0]  (!%p2792_p1), %s2735_s7, 256, %s419_s15, [#allocation11], %s2794_s21, %s2794_s21, %s2793_s1  }
  0x79   : > { %s434_s16 = sshll.u32 %s2213_s22, 4  ;;  %s2024_s11 = scalar_lea.hbm %s2736_s8, 16  ;;  %s435_s16 = int_to_ptr.vmem [resolvable:$true] %s434_s16 }
  0x7a   : > { %p2025_p3 = scmp.ne.s32.totalorder %s2736_s8, %s2024_s11  ;;  %p2031_p6 = scmp.lt.u32.totalorder %s2024_s11, %s2736_s8 }
  0x7c   : > { %p2027_p13 = pnand %p2025_p3, %p2791_p11 }
  0x7e   : > { %p2028_p10 = pneg %p2027_p13 }
  0x80   : > { %p2033_p8 = pnand %p2031_p6, %p2028_p10 }
  0x82   : > { %2036 = shalt.err (!%p2033_p8)
}
  0x83   : > { %s2037_s15 = scalar_lea.vmem %s435_s16, 16  ;;  %s2044_s1 = scalar_lea.vmem %s435_s16, 32 }
  0x84   : > { %p2038_p12 = scmp.ne.s32.totalorder %s435_s16, %s2037_s15  ;;  %p2045_p9 = scmp.lt.s32.totalorder %s435_s16, %s435_s16 }
  0x85   : > { %p2046_p2 = scmp.lt.s32.totalorder %s2044_s1, %s2037_s15 }
  0x86   : > { %p2040_p0 = pnand %p2038_p12, %p2791_p11 }
  0x87   : > { %p2047_p4 = por %p2046_p2, %p2045_p9 }
  0x88   : > { %p2041_p5 = pneg %p2040_p0 }
  0x8a   : > { %p2048_p7 = pnand %p2047_p4, %p2041_p5 }
  0x8c   : > { %2051 = shalt.err (!%p2048_p7)
}
  0x8d   : > { %1828 = dma.hbm_to_vmem [thread:$0]  (!%p2792_p1), %s2736_s8, 16, %s435_s16, [#allocation14]  }
  0x8e   : > { %s2492_s28 = scalar_lea.hbm %s2728_s0, %s2397_s26  ;;  %s460_s13 = scalar_lea.vmem [#allocation4], %s2394_s29 }
  0x8f   : > { %s468_s10 = sshll.u32 %s460_s13, 4  ;;  %s2795_s30 = sand.u32 1, %s2194_s19   ;;  %s469_s10 = int_to_ptr.vmem [resolvable:$true] %s468_s10 }
  0x90   : > { %s457_s22 = scalar_lea.sflag [#allocation5], %s2795_s30  ;;  %s2052_s12 = scalar_lea.hbm %s2492_s28, 64 }
  0x91   : > { %p2053_p7 = scmp.ne.s32.totalorder %s2492_s28, %s2052_s12  ;;  %p2796_p11 = scmp.ne.s32.totalorder %s2790_s3, 0 }
  0x92   : > { %s2057_s11 = scalar_lea.hbm %s2728_s0, 128  ;;  %p2058_p1 = scmp.lt.u32.totalorder %s2492_s28, %s2728_s0 }
  0x93   : > { %p2055_p3 = pnand %p2053_p7, %p2796_p11  ;;  %p2059_p10 = scmp.lt.u32.totalorder %s2057_s11, %s2052_s12 }
  0x94   : > { %p2061_p8 = scmp.lt.u32.totalorder %s2052_s12, %s2492_s28 }
  0x95   : > { %p2056_p13 = pneg %p2055_p3  ;;  %p2060_p6 = por %p2059_p10, %p2058_p1 }
  0x97   : > { %p2062_p12 = por %p2061_p8, %p2060_p6 }
  0x99   : > { %p2063_p0 = pnand %p2062_p12, %p2056_p13 }
  0x9b   : > { %2066 = shalt.err (!%p2063_p0)
}
  0x9c   : > { %s2067_s1 = scalar_lea.vmem %s469_s10, 64  ;;  %s2214_s9 = smov [#allocation4]  }
  0x9d   : > { %p2068_p5 = scmp.ne.s32.totalorder %s469_s10, %s2067_s1  ;;  %s2072_s21 = sshll.u32 %s2214_s9, 4  ;;  %s2073_s21 = int_to_ptr.vmem [resolvable:$false] %s2072_s21 }
  0x9e   : > { %s2074_s4 = scalar_lea.vmem %s2073_s21, 128  ;;  %p2075_p4 = scmp.lt.s32.totalorder %s469_s10, %s2073_s21 }
  0x9f   : > { %p2070_p9 = pnand %p2068_p5, %p2796_p11  ;;  %p2076_p7 = scmp.lt.s32.totalorder %s2074_s4, %s2067_s1 }
  0xa1   : > { %p2071_p2 = pneg %p2070_p9  ;;  %p2077_p3 = por %p2076_p7, %p2075_p4 }
  0xa3   : > { %p2078_p1 = pnand %p2077_p3, %p2071_p2 }
  0xa5   : > { %2081 = shalt.err (!%p2078_p1)
}
  0xa6   : > { %p2797_p10 = scmp.ne.s32.totalorder %s2788_s14, 0  ;;  %s2518_s30 = scalar_lea.hbm %s2730_s2, %s2397_s26 }
  0xa7   : > { %s497_s12 = scalar_lea.vmem [#allocation9], %s2394_s29  ;;  %s2082_s17 = scalar_lea.hbm %s2518_s30, 64 }
  0xa8   : > { %1832 = dma.hbm_to_vmem [thread:$0]  (!%p2797_p10), %s2492_s28, 64, %s469_s10, %s457_s22  }
  0xa9   : > { %s504_s16 = sshll.u32 %s497_s12, 4  ;;  %p2083_p13 = scmp.ne.s32.totalorder %s2518_s30, %s2082_s17  ;;  %s505_s16 = int_to_ptr.vmem [resolvable:$true] %s504_s16 }
  0xaa   : > { %s2087_s28 = scalar_lea.hbm %s2730_s2, 128  ;;  %p2088_p12 = scmp.lt.u32.totalorder %s2518_s30, %s2730_s2 }
  0xab   : > { %p2085_p6 = pnand %p2083_p13, %p2796_p11  ;;  %p2089_p0 = scmp.lt.u32.totalorder %s2087_s28, %s2082_s17 }
  0xac   : > { %p2091_p9 = scmp.lt.u32.totalorder %s2082_s17, %s2518_s30 }
  0xad   : > { %p2086_p8 = pneg %p2085_p6  ;;  %p2090_p5 = por %p2089_p0, %p2088_p12 }
  0xaf   : > { %p2092_p2 = por %p2091_p9, %p2090_p5 }
  0xb1   : > { %p2093_p4 = pnand %p2092_p2, %p2086_p8 }
  0xb3   : > { %2096 = shalt.err (!%p2093_p4)
}
  0xb4   : > { %s2097_s29 = scalar_lea.vmem %s505_s16, 64  ;;  %s2215_s26 = smov [#allocation9]  }
  0xb5   : > { %p2098_p7 = scmp.ne.s32.totalorder %s505_s16, %s2097_s29  ;;  %s2102_s15 = sshll.u32 %s2215_s26, 4  ;;  %s2103_s15 = int_to_ptr.vmem [resolvable:$false] %s2102_s15 }
  0xb6   : > { %s2104_s1 = scalar_lea.vmem %s2103_s15, 128  ;;  %p2105_p13 = scmp.lt.s32.totalorder %s505_s16, %s2103_s15 }
  0xb7   : > { %p2100_p3 = pnand %p2098_p7, %p2796_p11  ;;  %p2106_p6 = scmp.lt.s32.totalorder %s2104_s1, %s2097_s29 }
  0xb9   : > { %p2101_p1 = pneg %p2100_p3  ;;  %p2107_p10 = por %p2106_p6, %p2105_p13 }
  0xbb   : > { %p2108_p0 = pnand %p2107_p10, %p2101_p1 }
  0xbd   : > { %2111 = shalt.err (!%p2108_p0)
}
  0xbe   : > { %p2798_p12 = scmp.ne.s32.totalorder %s2788_s14, 0  ;;  %p2799_p8 = scmp.ne.s32.totalorder %s2779_s27, 0 }
  0xbf   : > { %s2542_s3 = sand.u32 (!%p2799_p8), 1, %s2190_s18   ;;  %p2800_p11 = scmp.ne.s32.totalorder (!%p2799_p8), %s2776_s25, 0 }
  0xc0   : > { %1838 = dma.hbm_to_vmem [thread:$0]  (!%p2798_p12), %s2518_s30, 64, %s505_s16, %s2418_s24  }
  0xc1   : > { %513 = sbr.rel (%p2799_p8) target bundleno = 1518 (0x5ee), region = 64  ;;  %s2545_s9 = sshll.u32 (!%p2799_p8), %s2542_s3, 2 }
  0xc2   : > { %s516_s21 = scalar_lea.sflag (!%p2799_p8), [#allocation5], %s2542_s3  ;;  %s519_s4 = scalar_lea.vmem (!%p2799_p8), [#allocation4], %s2545_s9 }
  0xc8   : > { %2165 = dma.done.wait (%p2800_p11), %s516_s21, 64  }
  0xc9   : > { %2167 = vsyncadd (%p2800_p11), %s516_s21, 4294967232  ;;  %s524_s27 = sand.u32 1, %s2316_s23   ;;  %s528_s24 = scalar_lea.vmem [#allocation7], %s2545_s9 }
  0xca   : > { %s525_s14 = scalar_lea.sflag [#allocation8], %s524_s27 }
  0xcb   : > { %2169 = dma.done.wait (%p2800_p11), %s525_s14, 128  }
  0xcc   : > { %2171 = vsyncadd (%p2800_p11), %s525_s14, 4294967168  ;;  %s537_s6 = scalar_lea.vmem [#allocation9], %s2545_s9  ;;  %p2801_p10 = scmp.eq.s32.totalorder %s2316_s23, 0 }
  0xce   : > { %2173 = dma.done.wait (%p2801_p10), [#allocation11], 512   ;;  %p2802_p5 = pmov %p2801_p10 }
  0xd0   : > { %2175 = vsyncadd (%p2802_p5), [#allocation11], 4294966784  ;;  %p2803_p9 = pmov %p2802_p5 }
  0xd1   : > { %p2804_p2 = pmov %p2802_p5 }
  0xd2   : > { %2177 = dma.done.wait (%p2803_p9), [#allocation14], 16  }
  0xd3   : > { %2179 = vsyncadd (%p2804_p2), [#allocation14], 4294967280  ;;  %v2216_v0 = vmov 0.0   ;;  %vm2217_vm0 = vmmov 0   ;;  %v1912_v1 = vld [vmem:[%s2733_s5] sm:$0xff]   ;;  %v1913_v2 = vld [vmem:[%s2733_s5 + $0x8] sm:$0xff]  }
  0xd4   : > { %1719 = vmatprep.subr.bf16.mxu0 %v2216_v0  ;;  %1723 = vmatprep.mubr.msk.bf16.mxu0 %vm2217_vm0, %v2216_v0  ;;  %v635_v3 = vld [vmem:[%s528_s24] sm:$0xf]  ;;  %vm660_vm1 = vcmask 261120   ;;  %v1914_v4 = vld [vmem:[#allocation10] sm:$0xff]   ;;  %v1915_v5 = vld [vmem:[#allocation10 + $0x8] sm:$0xff]   ;;  %s2805_s17 = sld [smem:[#allocation32_spill]] }
  0xd5   : > { %1727 = vmatprep.subr.bf16.mxu1 %v2216_v0  ;;  %1731 = vmatprep.mubr.msk.bf16.mxu1 %vm2217_vm0, %v2216_v0  ;;  %v779_v6 = vld [vmem:[%s519_s4] sm:$0xf]  ;;  %v1916_v7 = vld [vmem:[#allocation12] sm:$0xff]   ;;  %v1917_v8 = vld [vmem:[#allocation12 + $0x8] sm:$0xff]   ;;  %vm773_vm2 = vcmask 257024   ;;  %s2806_s28 = sld [smem:[#allocation31_spill]] }
  0xd6   : > { %1720 = vmatpush3.bf16.msra.mxu0 %v1912_v1  ;;  %1728 = vmatpush3.bf16.msra.mxu1 %v1916_v7  ;;  %v636_v9 = vld [vmem:[%s537_s6] sm:$0xf]  ;;  %vm855_vm3 = vcmask 64512   ;;  %s2218_s10 = smov 112   ;;  %s2219_s22 = smov 120   ;;  %vm915_vm4 = vcmask 1043456  }
  0xd7   : > { %1721 = vmatprep.subr.bf16.mxu0 %v2216_v0  ;;  %1729 = vmatprep.subr.bf16.mxu1 %v2216_v0  ;;  %s2220_s29 = smov 104   ;;  %v1665_v28 = vld [vmem:[#allocation13] ss:$0 sm:$0xff]  ;;  %s2807_s1 = sld [smem:[#allocation33_spill]]  ;;  %vm1314_vm5 = vcmask 130048   ;;  %vm1317_vm6 = vcmask 195584  }
  0xd8   : > { %s2221_s4 = smov 8   ;;  %s2222_s27 = smov 16  }
  0xd9   : > { %s2223_s14 = smov 24   ;;  %s2808_s24 = sld [smem:[#allocation22_spill]] }
  0xda   : > { %1722 = vmatpush3.bf16.msra.mxu0 %v1913_v2  ;;  %1730 = vmatpush3.bf16.msra.mxu1 %v1917_v8  ;;  %v1661_v10 = vld [vmem:[%s2805_s17] ss:$0 sm:$0xff]  ;;  %s1660_s6 = sshll.u32 %s2542_s3, 3  ;;  %s2809_s23 = sld [smem:[#allocation34_spill]] }
  0xdb   : > { %1735 = vmatprep.subr.bf16.mxu0 %v2216_v0  ;;  %1743 = vmatprep.subr.bf16.mxu1 %v2216_v0  ;;  %v1669_v17 = vld [vmem:[%s2806_s28] ss:$0 sm:$0xff]  ;;  %s2810_s30 = sld [smem:[#allocation27_spill]]  ;;  %s613_s16 = scalar_lea.vmem [#allocation15], %s1660_s6 }
  0xdc   : > { %s1413_s17 = sshll.u32 %s613_s16, 4  ;;  %s2811_s28 = sld [smem:[#allocation35_spill]]  ;;  %s2680_s17 = int_to_ptr.vmem [resolvable:$true] %s1413_s17 }
  0xdd   : > { %1724 = vmatmul.mubr.msk.bf16.vlgmr.msra.gmra.mrb[0].mxu0 %vm660_vm1, %v635_v3  ;;  %1732 = vmatmul.mubr.msk.bf16.vlgmr.msra.gmra.mrb[0].mxu1 %vm660_vm1, %v636_v9  ;;  %s2224_s26 = smov [#allocation15]  }
  0xde   : > { %1736 = vmatpush3.bf16.msra.mxu0 %v1914_v4  ;;  %1739 = vmatprep.mubr.msk.bf16.mxu0 %vm2217_vm0, %v2216_v0  ;;  %s2116_s15 = sshll.u32 %s2224_s26, 4  ;;  %s2117_s15 = int_to_ptr.vmem [resolvable:$false] %s2116_s15 }
  0xdf   : > { %1737 = vmatprep.subr.bf16.mxu0 %v2216_v0  ;;  %1745 = vmatprep.mubr.msk.bf16.mxu1 %vm2217_vm0, %v2216_v0  ;;  %s1688_s12 = sshll.u32 %s2808_s24, 7  ;;  %s2118_s9 = scalar_lea.vmem %s2117_s15, 256 }
  0xe0   : > { %p2119_p13 = scmp.lt.s32.totalorder %s2680_s17, %s2117_s15 }
  0xe1   : > { %p2812_p7 = scmp.ne.s32.totalorder %s2810_s30, 0 }
  0xe2   : > { %1738 = vmatpush3.bf16.msra.mxu0 %v1915_v5 }
  0xe3   : > { %1749 = vmatprep.subr.bf16.mxu0 %v2216_v0 }
  0xe5   : > { %1740 = vmatmul.mubr.msk.bf16.vlgmr.msra.gmra.mrb[4].mxu0 %vm660_vm1, %v779_v6 }
  0xe6   : > { %1751 = vmatprep.mubr.msk.bf16.mxu0 %vm2217_vm0, %v2216_v0 }
 0x1b0   : > { %v698_v11 = vpop.f32.mrb[0].mxu0  ;;  %v764_v29 = vpop.f32.mrb[0].mxu1 }
 0x1b1   : > { %v699_v12 = vadd.f32 %v1661_v10, %v698_v11  ;;  %v1725_v13 = vpop.f32.mrb[1].mxu0  ;;  %v765_v30 = vadd.f32 %v1665_v28, %v764_v29  ;;  %v1733_v31 = vpop.f32.mrb[1].mxu1 }
 0x1b2   : > { %v701_v14 = vpop.f32.mrb[2].mxu0  ;;  %v767_v32 = vpop.f32.mrb[2].mxu1 }
 0x1b3   : > { %v770_v15 = vpack.c.bf16 %v699_v12, %v699_v12  ;;  %v1726_v16 = vpop.f32.mrb[3].mxu0  ;;  %v775_v33 = vpack.c.bf16 %v765_v30, %v765_v30  ;;  %v1734_v34 = vpop.f32.mrb[3].mxu1 }
 0x1b5   : > { %774 = vst.msk [vmem:[#allocation2] sm:$0xf] %vm773_vm2, %v770_v15  ;;  %778 = vst.msk [vmem:[#allocation3] sm:$0xf] %vm773_vm2, %v775_v33 }
 0x1b8   : > { %v841_v18 = vpop.f32.mrb[4].mxu0 }
 0x1b9   : > { %v842_v19 = vadd.f32 %v1669_v17, %v841_v18  ;;  %v1741_v20 = vpop.f32.mrb[5].mxu0 }
 0x1ba   : > { %v844_v21 = vpop.f32.mrb[6].mxu0 }
 0x1bb   : > { %v847_v22 = vmul.f32 0.35355338, %v842_v19  ;;  %v1742_v23 = vpop.f32.mrb[7].mxu0 }
 0x1bc   : > { %v851_v24 = vld [vmem:[#allocation2] sm:$0xf]  ;;  %v854_v35 = vld [vmem:[#allocation3] sm:$0xf] }
 0x1bd   : > { %v860_v25 = vsel %vm855_vm3, %v851_v24, 0  ;;  %v1675_v26 = vcombine.low %v851_v24, %v851_v24  ;;  %v848_v27 = vpack.c.bf16 %v847_v22, %v847_v22  ;;  %v917_v36 = vsel %vm915_vm4, %v854_v35, 0 }
 0x1be   : > { %1744 = vmatpush3.bf16.xpose.msra.mxu1 %v860_v25  ;;  %1750 = vmatpush3.bf16.msra.mxu0 %v917_v36  ;;  %v1677_v1 = vcombine.low %v854_v35, %v854_v35 }
 0x1bf   : > { %1082 = vrot.lane.b32.xlu1 %v1675_v26, %s2218_s10  ;;  %968 = vrot.lane.b32.xlu0 %v1675_v26, %s2219_s22 }
 0x1c0   : > { %1755 = vmatprep.subr.bf16.mxu1 %v2216_v0  ;;  %1761 = vmatprep.subr.bf16.mxu0 %v2216_v0 }
 0x1c3   : > { %1080 = vrot.lane.b32.xlu1 %v848_v27, %s2218_s10  ;;  %963 = vrot.lane.b32.xlu0 %v848_v27, %s2219_s22 }
 0x1c5   : > { %1746 = vmatmul.mubr.msk.bf16.vlgmr.msra.gmra.mrb[4].mxu1 %vm855_vm3, %v848_v27 }
 0x1c6   : > { %1757 = vmatprep.mubr.msk.bf16.mxu1 %vm2217_vm0, %v2216_v0 }
 0x1c7   : > { %1191 = vrot.lane.b32.xlu1 %v848_v27, %s2220_s29  ;;  %1193 = vrot.lane.b32.xlu0 %v1675_v26, %s2220_s29 }
 0x231   : > { %v969_v37 = vpop.permute.xlu0 %968  ;;  %v1083_v39 = vpop.permute.xlu1 %1082 }
 0x232   : > { %v974_v38 = vsel %vm855_vm3, %v969_v37, 0  ;;  %v1088_v41 = vsel %vm855_vm3, %v1083_v39, 0 }
 0x233   : > { %1756 = vmatpush3.bf16.xpose.msra.mxu1 %v974_v38 }
 0x234   : > { %1767 = vmatprep.subr.bf16.mxu1 %v2216_v0 }
 0x235   : > { %v964_v40 = vpop.permute.xlu0 %963  ;;  %v1081_v43 = vpop.permute.xlu1 %1080 }
 0x239   : > { %v1194_v42 = vpop.permute.xlu0 %1193  ;;  %v1192_v45 = vpop.permute.xlu1 %1191 }
 0x23a   : > { %1758 = vmatmul.mubr.msk.bf16.vlgmr.msra.gmra.mrb[8].mxu1 %vm855_vm3, %v964_v40  ;;  %v1199_v44 = vsel %vm855_vm3, %v1194_v42, 0  ;;  %v1920_v42 = vld [vmem:[%s2807_s1] sm:$0xff]  }
 0x23b   : > { %1768 = vmatpush3.bf16.xpose.msra.mxu1 %v1088_v41  ;;  %1769 = vmatprep.mubr.msk.bf16.mxu1 %vm2217_vm0, %v2216_v0 }
 0x23c   : > { %1779 = vmatprep.subr.bf16.mxu1 %v2216_v0 }
 0x242   : > { %1770 = vmatmul.mubr.msk.bf16.vlgmr.msra.gmra.mrb[12].mxu1 %vm855_vm3, %v1081_v43 }
 0x243   : > { %1780 = vmatpush3.bf16.xpose.msra.mxu1 %v1199_v44  ;;  %1781 = vmatprep.mubr.msk.bf16.mxu1 %vm2217_vm0, %v2216_v0 }
 0x244   : > { %1791 = vmatprep.subr.bf16.mxu1 %v2216_v0 }
 0x24a   : > { %1782 = vmatmul.mubr.msk.bf16.vlgmr.msra.gmra.mrb[16].mxu1 %vm855_vm3, %v1192_v45 }
 0x24b   : > { %1795 = vmatprep.mubr.msk.bf16.mxu1 %vm2217_vm0, %v2216_v0  ;;  %1792 = vmatpush3.bf16.msra.mxu1 %v1920_v42 }
 0x24c   : > { %1793 = vmatprep.subr.bf16.mxu1 %v2216_v0 }
 0x298   : > { %v896_v46 = vpop.f32.mrb[4].mxu1 }
 0x299   : > { %v1747_v47 = vpop.f32.mrb[5].mxu1  ;;  %v902_v48 = vsel %vm855_vm3, %v896_v46, -inf }
 0x29a   : > { %903 = vmax.xlane.f32.xlu0 %v902_v48  ;;  %v899_v49 = vpop.f32.mrb[6].mxu1 }
 0x29b   : > { %v1748_v50 = vpop.f32.mrb[7].mxu1 }
 0x30d   : > { %v1010_v51 = vpop.f32.mrb[8].mxu1 }
 0x30e   : > { %v1759_v52 = vpop.f32.mrb[9].mxu1  ;;  %v1016_v53 = vsel %vm855_vm3, %v1010_v51, -inf }
 0x30f   : > { %1017 = vmax.xlane.f32.xlu1 %v1016_v53  ;;  %v1013_v54 = vpop.f32.mrb[10].mxu1 }
 0x310   : > { %v1760_v55 = vpop.f32.mrb[11].mxu1 }
 0x315   : > { %v1124_v56 = vpop.f32.mrb[12].mxu1 }
 0x316   : > { %v1771_v57 = vpop.f32.mrb[13].mxu1  ;;  %v1130_v58 = vsel %vm855_vm3, %v1124_v56, -inf }
 0x317   : > { %1131 = vmax.xlane.f32.xlu0 %v1130_v58  ;;  %v1127_v59 = vpop.f32.mrb[14].mxu1 }
 0x318   : > { %v1772_v60 = vpop.f32.mrb[15].mxu1 }
 0x31d   : > { %v1235_v61 = vpop.f32.mrb[16].mxu1 }
 0x31e   : > { %v1783_v62 = vpop.f32.mrb[17].mxu1  ;;  %v1241_v63 = vsel %vm855_vm3, %v1235_v61, -inf }
 0x31f   : > { %1242 = vmax.xlane.f32.xlu0 %v1241_v63  ;;  %v1238_v2 = vpop.f32.mrb[18].mxu1 }
 0x320   : > { %1029 = vrot.lane.b32.xlu1 %v1677_v1, %s2219_s22  ;;  %v1784_v3 = vpop.f32.mrb[19].mxu1  ;;  %s1399_s22 = scalar_lea.sflag [#allocation6], %s2542_s3 }
 0x324   : > { %1251 = vrot.lane.b32.xlu1 %v1677_v1, %s2220_s29  ;;  %s2112_s29 = scalar_lea.vmem %s2680_s17, 128 }
 0x325   : > { %p2113_p4 = scmp.ne.s32.totalorder %s2680_s17, %s2112_s29  ;;  %p2120_p6 = scmp.lt.s32.totalorder %s2118_s9, %s2112_s29 }
 0x327   : > { %v904_v4 = vpop.xlane.xlu0 %903  ;;  %p2114_p3 = pnand %p2113_p4, %p2812_p7  ;;  %p2121_p0 = por %p2120_p6, %p2119_p13 }
 0x328   : > { %v905_v5 = vsub.f32 %v896_v46, %v904_v4  ;;  %v1921_v46 = vld [vmem:[%s2807_s1 + $0x8] sm:$0xff]  }
 0x329   : > { %1794 = vmatpush3.bf16.msra.mxu1 %v1921_v46  ;;  %p2115_p1 = pneg %p2114_p3 }
 0x32a   : > { %v906_v6 = vmul.f32 1.442695, %v905_v5 }
 0x32b   : > { %p2122_p12 = pnand %p2121_p0, %p2115_p1 }
 0x32c   : > { %1922 = vpow2.f32 %v906_v6 }
 0x335   : > { %1140 = vrot.lane.b32.xlu0 %v1677_v1, %s2218_s10  ;;  %s2678_s10 = scalar_lea.hbm %s2811_s28, %s1688_s12 }
 0x336   : > { %v1923_v7 = vpop.eup %1922 }
 0x337   : > { %v911_v8 = vpack.c.bf16 %v1923_v7, %v1923_v7  ;;  %v908_v24 = vsel %vm855_vm3, %v1923_v7, 0.0 }
 0x339   : > { %1752 = vmatmul.mubr.msk.bf16.vlgmr.msra.gmra.mrb[8].mxu0 %vm855_vm3, %v911_v8 }
 0x33a   : > { %1763 = vmatprep.mubr.msk.bf16.mxu0 %vm2217_vm0, %v2216_v0 }
 0x39c   : > { %v1018_v9 = vpop.xlane.xlu1 %1017 }
 0x39d   : > { %v1019_v10 = vsub.f32 %v1010_v51, %v1018_v9 }
 0x39f   : > { %v1020_v11 = vmul.f32 1.442695, %v1019_v10  ;;  %v1686_v10 = vld [vmem:[%s2809_s23] ss:$0 sm:$0xff] }
 0x3a0   : > { %v1030_v12 = vpop.permute.xlu1 %1029 }
 0x3a1   : > { %1924 = vpow2.f32 %v1020_v11  ;;  %v1035_v13 = vsel %vm915_vm4, %v1030_v12, 0 }
 0x3a2   : > { %1762 = vmatpush3.bf16.msra.mxu0 %v1035_v13 }
 0x3a3   : > { %1773 = vmatprep.subr.bf16.mxu0 %v2216_v0 }
 0x3a4   : > { %v1132_v14 = vpop.xlane.xlu0 %1131  ;;  %v1252_v27 = vpop.permute.xlu1 %1251 }
 0x3a5   : > { %v1133_v15 = vsub.f32 %v1124_v56, %v1132_v14  ;;  %v1257_v30 = vsel %vm915_vm4, %v1252_v27, 0 }
 0x3a7   : > { %v1134_v16 = vmul.f32 1.442695, %v1133_v15 }
 0x3a9   : > { %1926 = vpow2.f32 %v1134_v16 }
 0x3ab   : > { %v1925_v17 = vpop.eup %1924 }
 0x3ac   : > { %v1243_v18 = vpop.xlane.xlu0 %1242  ;;  %v1022_v19 = vsel %vm855_vm3, %v1925_v17, 0.0  ;;  %v1025_v20 = vpack.c.bf16 %v1925_v17, %v1925_v17 }
 0x3ad   : > { %v1244_v21 = vsub.f32 %v1235_v61, %v1243_v18  ;;  %1023 = vadd.xlane.f32.xlu1 %v1022_v19 }
 0x3ae   : > { %1764 = vmatmul.mubr.msk.bf16.vlgmr.msra.gmra.mrb[12].mxu0 %vm855_vm3, %v1025_v20 }
 0x3af   : > { %v1245_v22 = vmul.f32 1.442695, %v1244_v21  ;;  %1775 = vmatprep.mubr.msk.bf16.mxu0 %vm2217_vm0, %v2216_v0 }
 0x3b0   : > { %v1141_v23 = vpop.permute.xlu0 %1140 }
 0x3b1   : > { %1928 = vpow2.f32 %v1245_v22  ;;  %v1146_v25 = vsel %vm915_vm4, %v1141_v23, 0  ;;  %909 = vadd.xlane.f32.xlu1 %v908_v24 }
 0x3b2   : > { %1774 = vmatpush3.bf16.msra.mxu0 %v1146_v25 }
 0x3b3   : > { %v1927_v26 = vpop.eup %1926  ;;  %1785 = vmatprep.subr.bf16.mxu0 %v2216_v0 }
 0x3b4   : > { %v1136_v28 = vsel %vm855_vm3, %v1927_v26, 0.0  ;;  %v1139_v29 = vpack.c.bf16 %v1927_v26, %v1927_v26 }
 0x3b5   : > { %1137 = vadd.xlane.f32.xlu0 %v1136_v28 }
 0x3b6   : > { %1776 = vmatmul.mubr.msk.bf16.vlgmr.msra.gmra.mrb[16].mxu0 %vm855_vm3, %v1139_v29 }
 0x3b7   : > { %1786 = vmatpush3.bf16.msra.mxu0 %v1257_v30  ;;  %1787 = vmatprep.mubr.msk.bf16.mxu0 %vm2217_vm0, %v2216_v0 }
 0x3bb   : > { %v1929_v31 = vpop.eup %1928 }
 0x3bc   : > { %v1247_v32 = vsel %vm855_vm3, %v1929_v31, 0.0  ;;  %v1250_v33 = vpack.c.bf16 %v1929_v31, %v1929_v31 }
 0x3bd   : > { %1248 = vadd.xlane.f32.xlu0 %v1247_v32 }
 0x3be   : > { %1788 = vmatmul.mubr.msk.bf16.vlgmr.msra.gmra.mrb[20].mxu0 %vm855_vm3, %v1250_v33 }
 0x40c   : > { %v953_v34 = vpop.f32.mrb[8].mxu0 }
 0x40d   : > { %v1753_v35 = vpop.f32.mrb[9].mxu0 }
 0x40e   : > { %v956_v36 = vpop.f32.mrb[10].mxu0 }
 0x40f   : > { %v1754_v37 = vpop.f32.mrb[11].mxu0 }
 0x43a   : > { %v1024_v38 = vpop.xlane.xlu1 %1023 }
 0x43b   : > { %1930 = vrcp.f32 %v1024_v38 }
 0x43e   : > { %v910_v63 = vpop.xlane.xlu1 %909 }
 0x442   : > { %v1138_v39 = vpop.xlane.xlu0 %1137 }
 0x443   : > { %1932 = vrcp.f32 %v1138_v39 }
 0x445   : > { %v1931_v40 = vpop.eup %1930 }
 0x44a   : > { %v1249_v47 = vpop.xlane.xlu0 %1248 }
 0x44b   : > { %1934 = vrcp.f32 %v1249_v47 }
 0x44c   : > { %1936 = vrcp.f32 %v910_v63 }
 0x44d   : > { %v1933_v50 = vpop.eup %1932 }
 0x455   : > { %v1935_v57 = vpop.eup %1934 }
 0x456   : > { %v1937_v1 = vpop.eup %1936 }
 0x457   : > { %v960_v2 = vmul.f32 %v1937_v1, %v953_v34 }
 0x459   : > { %v961_v5 = vpack.c.bf16 %v960_v2, %v960_v2 }
 0x481   : > { %v1071_v41 = vpop.f32.mrb[12].mxu0 }
 0x482   : > { %v1078_v43 = vmul.f32 %v1931_v40, %v1071_v41  ;;  %v1765_v44 = vpop.f32.mrb[13].mxu0 }
 0x483   : > { %v1074_v45 = vpop.f32.mrb[14].mxu0 }
 0x484   : > { %v1079_v48 = vpack.c.bf16 %v1078_v43, %v1078_v43  ;;  %v1766_v49 = vpop.f32.mrb[15].mxu0 }
 0x486   : > { %1303 = vrot.lane.b32.xlu0 %v1079_v48, %s2221_s4 }
 0x489   : > { %v1182_v51 = vpop.f32.mrb[16].mxu0 }
 0x48a   : > { %v1189_v52 = vmul.f32 %v1933_v50, %v1182_v51  ;;  %v1777_v53 = vpop.f32.mrb[17].mxu0 }
 0x48b   : > { %v1185_v54 = vpop.f32.mrb[18].mxu0 }
 0x48c   : > { %v1190_v55 = vpack.c.bf16 %v1189_v52, %v1189_v52  ;;  %v1778_v56 = vpop.f32.mrb[19].mxu0 }
 0x48e   : > { %1306 = vrot.lane.b32.xlu1 %v1190_v55, %s2222_s27 }
 0x491   : > { %v1293_v58 = vpop.f32.mrb[20].mxu0 }
 0x492   : > { %v1300_v59 = vmul.f32 %v1935_v57, %v1293_v58  ;;  %v1789_v60 = vpop.f32.mrb[21].mxu0 }
 0x493   : > { %v1296_v61 = vpop.f32.mrb[22].mxu0 }
 0x494   : > { %v1301_v62 = vpack.c.bf16 %v1300_v59, %v1300_v59  ;;  %v1790_v0 = vpop.f32.mrb[23].mxu0 }
 0x496   : > { %1309 = vrot.lane.b32.xlu1 %v1301_v62, %s2223_s14 }
 0x4f8   : > { %v1304_v3 = vpop.permute.xlu0 %1303 }
 0x4f9   : > { %v1313_v6 = vsel %vm855_vm3, %v961_v5, %v1304_v3 }
 0x500   : > { %v1307_v4 = vpop.permute.xlu1 %1306 }
 0x501   : > { %v1316_v7 = vsel %vm1314_vm5, %v1313_v6, %v1307_v4 }
 0x508   : > { %v1310_v8 = vpop.permute.xlu1 %1309 }
 0x509   : > { %v1319_v9 = vsel %vm1317_vm6, %v1316_v7, %v1310_v8 }
 0x50a   : > { %1796 = vmatmul.mubr.msk.bf16.vlgmr.msra.gmra.mrb[20].mxu1 %vm660_vm1, %v1319_v9 }
 0x5dd   : > { %v1372_v11 = vpop.f32.mrb[20].mxu1 }
 0x5de   : > { %v1389_v12 = vadd.f32 %v1686_v10, %v1372_v11  ;;  %v1797_v13 = vpop.f32.mrb[21].mxu1 }
 0x5df   : > { %v1375_v14 = vpop.f32.mrb[22].mxu1 }
 0x5e0   : > { %v1798_v15 = vpop.f32.mrb[23].mxu1  ;;  %1390 = vst.msk [vmem:[%s613_s16] sm:$0xff] %vm660_vm1, %v1389_v12 }
 0x5e1   : > { %2125 = shalt.err (!%p2122_p12)
}
 0x5e2   : > { %s2126_s3 = scalar_lea.hbm %s2678_s10, 128  ;;  %s2130_s27 = scalar_lea.hbm %s2811_s28, 256 }
 0x5e3   : > { %p2127_p8 = scmp.ne.s32.totalorder %s2678_s10, %s2126_s3  ;;  %p2131_p5 = scmp.lt.u32.totalorder %s2678_s10, %s2811_s28 }
 0x5e4   : > { %p2132_p9 = scmp.lt.u32.totalorder %s2130_s27, %s2126_s3  ;;  %p2134_p4 = scmp.lt.u32.totalorder %s2126_s3, %s2678_s10 }
 0x5e5   : > { %p2128_p11 = pnand %p2127_p8, %p2812_p7 }
 0x5e6   : > { %p2133_p2 = por %p2132_p9, %p2131_p5 }
 0x5e7   : > { %p2129_p10 = pneg %p2128_p11 }
 0x5e8   : > { %p2135_p3 = por %p2134_p4, %p2133_p2 }
 0x5ea   : > { %p2136_p1 = pnand %p2135_p3, %p2129_p10 }
 0x5ec   : > { %2139 = shalt.err (!%p2136_p1)
}
 0x5ed   : > { %1817 = dma.vmem_to_hbm [thread:$0]  (%p2812_p7), %s2680_s17, 128, %s2678_s10, %s1399_s22  }
 0x5ee PF: > { %s2813_s6 = sld [smem:[#allocation21_spill]]  ;;  %s2814_s25 = sld [smem:[#allocation25_spill]] }
 0x5ef   : > { %s2815_s13 = sld [smem:[#allocation24_spill]] }
 0x5f4   : > { %s1425_s23 = sand.u32 1, %s2813_s6   ;;  %p2816_p13 = scmp.ne.s32.totalorder %s2814_s25, 0 }
 0x5f5   : > { %p2817_p6 = scmp.ge.s32.totalorder %s2815_s13, 2  ;;  %s1426_s12 = scalar_lea.sflag [#allocation6], %s1425_s23 }
 0x5f7   : > { %p1840_p0 = pnand %p2817_p6, %p2816_p13 }
 0x5f9   : > { %2181 = dma.done.wait (!%p1840_p0), %s1426_s12, 128  }
 0x5fa   : > { %2183 = vsyncadd (!%p1840_p0), %s1426_s12, 4294967168  ;;  %s32_s22 = sadd.s32 1, %s2815_s13   ;;  %s2818_s30 = sld [smem:[#allocation28_spill]] }
 0x5fb   : > { %p29_p12 = scmp.ge.s32.totalorder %s32_s22, 4   ;;  %s2819_s20 = sld [smem:[#allocation23_spill]] }
 0x5fc   : > { %s2820_s21 = sld [smem:[#allocation26_spill]]  ;;  %s2821_s17 = smov %s2190_s18 }
 0x5fd   : > { %s2822_s18 = smov %s2194_s19  ;;  %31 = sbr.rel (!%p29_p12) target bundleno = 18 (0x12), region = 176 }
 0x600   : > { %s2823_s19 = smov %s2818_s30 }
 0x604   :  { %1431 = vsyncpa [#allocation5], 1 }
 0x605   :  { %1433 = vsyncpa [#allocation5 + $0x1], 1 }
 0x606   :  { %1434 = vsyncpa [#allocation8], 1 }
 0x607   :  { %1436 = vsyncpa [#allocation8 + $0x1], 1 }
 0x608   :  { %1437 = vsyncpa [#allocation11], 1 }
 0x609   :  { %1438 = vsyncpa [#allocation14], 1 }
 0x60a   :  { %1439 = vsyncpa [#allocation6], 1 }
 0x60b   :  { %1441 = vsyncpa [#allocation6 + $0x1], 1 }

</bundles_post_ra>
